<compile_context>
chip_gen: v7x
topology: tpu7x:2x2x1
jax: 0.10.0
libtpu: 0.0.40
codegen_flags: <defaults>
</compile_context>

<pallas_src>
import jax
import jax.numpy as jnp
import numpy as np
from jax import lax
from jax.experimental import pallas as pl
from jax.experimental.pallas import tpu as pltpu

LANE = 128


def round_up(x, m):
    return (x + m - 1) // m * m


# --------------------------------------------------------------------------
# Pallas kernel
# --------------------------------------------------------------------------
def make_kernel(n_tf, dict_leng, n_fc):
    def kernel(x_ref, wenc_ref, benc_ref, wnum_ref, *rest):
        fc_refs = rest[:-1]          # 2*n_fc refs: (w_i, b_i) per fc layer
        out_ref = rest[-1]

        x = x_ref[...]               # (BB, Fp) float32
        BB = x.shape[0]
        K1p = wenc_ref.shape[0]      # padded n_tf * dict_leng (multiple of 128)

        # ---- embedding lookup + Conv1d(kernel=n_tf) + mean(len-1) == ONE matmul ----
        # one-hot over the concatenated (token position, vocab) axis, built on the VPU
        col = lax.broadcasted_iota(jnp.int32, (BB, K1p), 1)
        onehot = jnp.zeros((BB, K1p), jnp.float32)
        for k in range(n_tf):                                  # static unroll, n_tf small
            tok = jnp.round(x[:, k:k + 1]).astype(jnp.int32)   # (BB, 1)  torch.round(x) ids
            onehot = onehot + (col == tok + k * dict_leng).astype(jnp.float32)

        enc = (jnp.dot(onehot, wenc_ref[...], preferred_element_type=jnp.float32)
               + benc_ref[...])                                # (BB, D1p)

        # ---- fc[0]: cat([enc, xn]) @ W0 folded into two matmuls (no concat) ----
        h = (jnp.dot(enc, fc_refs[0][...], preferred_element_type=jnp.float32)
             + jnp.dot(x, wnum_ref[...], preferred_element_type=jnp.float32)
             + fc_refs[1][...])

        # ---- remaining fc layers (the reference nn.Sequential has no activations) ----
        for i in range(1, n_fc):
            h = (jnp.dot(h, fc_refs[2 * i][...], preferred_element_type=jnp.float32)
                 + fc_refs[2 * i + 1][...])

        out_ref[...] = h.astype(out_ref.dtype)

    return kernel


# --------------------------------------------------------------------------
# Wrapper
# --------------------------------------------------------------------------
def mlpemb_pallas(x, kp, n_tf, dict_leng):
    """x: (B, n_tf + n_nf) float32.  Returns (B, fc[-1])."""
    B, F = x.shape
    Fp = kp["Fp"]
    out_p = kp["out_p"]
    out_dim = kp["out_dim"]
    n_fc = len(kp["fcs"])

    # batch blocking: sublane-aligned, folded into rows; "parallel" grid axis
    BB = min(round_up(B, 8), 256)
    Bp = round_up(B, BB)
    xp = jnp.zeros((Bp, Fp), jnp.float32).at[:B, :F].set(x.astype(jnp.float32))

    def full_spec(a):
        return pl.BlockSpec(a.shape, lambda b: (0,) * a.ndim)

    in_specs = [
        pl.BlockSpec((BB, Fp), lambda b: (b, 0)),
        full_spec(kp["w_embenc"]),
        full_spec(kp["b_enc"]),
        full_spec(kp["w_num"]),
    ]
    flat_fc = []
    for (w, bvec) in kp["fcs"]:
        in_specs += [full_spec(w), full_spec(bvec)]
        flat_fc += [w, bvec]

    out = pl.pallas_call(
        make_kernel(n_tf, dict_leng, n_fc),
        out_shape=jax.ShapeDtypeStruct((Bp, out_p), jnp.float32),
        grid_spec=pltpu.PrefetchScalarGridSpec(
            num_scalar_prefetch=0,
            grid=(Bp // BB,),
            in_specs=in_specs,
            out_specs=pl.BlockSpec((BB, out_p), lambda b: (b, 0)),
        ),
        compiler_params=pltpu.CompilerParams(
            dimension_semantics=("parallel",)
        ),
    )(xp, kp["w_embenc"], kp["b_enc"], kp["w_num"], *flat_fc)

    return out[:B, :out_dim]


# --------------------------------------------------------------------------
# Parameter construction (matches the nn.Module shapes) and kernel layouts
# --------------------------------------------------------------------------
def make_params(key, n_tf, n_nf, nD, D1, fc_dims, dict_leng):
    keys = jax.random.split(key, 3 + 2 * len(fc_dims))
    it = iter(keys)
    emb = jax.random.normal(next(it), (dict_leng, nD), jnp.float32)          # nn.Embedding
    conv_w = 0.3 * jax.random.normal(next(it), (D1, nD, n_tf), jnp.float32)  # Conv1d weight
    conv_b = 0.1 * jax.random.normal(next(it), (D1,), jnp.float32)           # Conv1d bias
    fcs = []
    din = D1 + n_nf
    for dout in fc_dims:   # nn.Linear (kaiming fan_out style scale)
        w = jnp.sqrt(2.0 / dout) * jax.random.normal(next(it), (dout, din), jnp.float32)
        b = 0.1 * jax.random.normal(next(it), (dout,), jnp.float32)
        fcs.append((w, b))
        din = dout
    return dict(emb=emb, conv_w=conv_w, conv_b=conv_b, fcs=fcs)


def _pad2(a, rows, cols):
    out = jnp.zeros((rows, cols), jnp.float32)
    return out.at[: a.shape[0], : a.shape[1]].set(a.astype(jnp.float32))


def prepare_params(raw, n_tf, n_nf, dict_leng):
    """Weight-only preprocessing: fuse embedding+Conv1d, pad everything to 128 lanes."""
    emb, conv_w, conv_b = raw["emb"], raw["conv_w"], raw["conv_b"]
    fcs = raw["fcs"]
    V, nD = emb.shape
    D1 = conv_w.shape[0]
    F = n_tf + n_nf

    K1p = round_up(n_tf * V, LANE)
    D1p = round_up(D1, LANE)
    Fp = round_up(F, LANE)

    # fused embedding+encoder weight:  W[k*V + v, o] = sum_c emb[v,c] * conv_w[o,c,k]
    w_embenc = jnp.concatenate([emb @ conv_w[:, :, k].T for k in range(n_tf)], axis=0)
    w_embenc_p = _pad2(w_embenc, K1p, D1p)
    b_enc_p = _pad2(conv_b[None, :], 1, D1p)

    # fc[0] split: encoder part + numerical part (token / padding rows zeroed)
    w0, b0 = fcs[0]
    H0 = w0.shape[0]
    H0p = round_up(H0, LANE)
    w0a_p = _pad2(w0[:, :D1].T, D1p, H0p)
    w_num = jnp.zeros((Fp, H0p), jnp.float32)
    w_num = w_num.at[n_tf:n_tf + n_nf, :H0].set(w0[:, D1:].T.astype(jnp.float32))
    b0_p = _pad2(b0[None, :], 1, H0p)

    fc_padded = [(w0a_p, b0_p)]
    hin_p = H0p
    for (w, b) in fcs[1:]:
        dout = w.shape[0]
        doutp = round_up(dout, LANE)
        fc_padded.append((_pad2(w.T, hin_p, doutp), _pad2(b[None, :], 1, doutp)))
        hin_p = doutp

    return dict(
        w_embenc=w_embenc_p, b_enc=b_enc_p, w_num=w_num, fcs=fc_padded,
        Fp=Fp, out_p=hin_p, out_dim=fcs[-1][0].shape[0],
    )


# --------------------------------------------------------------------------
# Pure-JAX reference (mirrors the PyTorch forward exactly)
# --------------------------------------------------------------------------
def mlpemb_ref(x, raw, n_tf):
    xt = jnp.round(x[:, :n_tf]).astype(jnp.int32)
    xn = x[:, n_tf:].astype(jnp.float32)
    tokens = jnp.take(raw["emb"], xt, axis=0)                  # (B, n_tf, nD)
    tin = jnp.transpose(tokens, (0, 2, 1))                     # (B, nD, n_tf)
    # Conv1d(nD, D1, kernel_size=n_tf) on a length-n_tf input -> length-1 output
    t = jnp.einsum("bcj,ocj->bo", tin, raw["conv_w"]) + raw["conv_b"][None, :]
    # torch.mean over the length-1 output axis is the identity
    h = jnp.concatenate([t, xn], axis=-1)
    for (w, b) in raw["fcs"]:
        h = h @ w.T + b[None, :]
    return h


# --------------------------------------------------------------------------
if __name__ == "__main__":
    key = jax.random.PRNGKey(0)
    k_tok, k_noise, k_num, k_p = jax.random.split(key, 4)

    # shapes from the module's docstring example
    n_tf, n_nf = 2, 3            # token / numerical features
    nD, D1 = 5, 7                # embedding dim, encoder_out_d
    fc_dims = [7, 3]             # layers['fc'], C = 3
    dict_leng = 10
    B = 8

    tok = jax.random.randint(k_tok, (B, n_tf), 0, dict_leng).astype(jnp.float32)
    tok = tok + jax.random.uniform(k_noise, (B, n_tf), minval=-0.3, maxval=0.3)
    num = jax.random.normal(k_num, (B, n_nf), jnp.float32)
    x = jnp.concatenate([tok, num], axis=-1)                   # (B, n_tf + n_nf)

    raw = make_params(k_p, n_tf, n_nf, nD, D1, fc_dims, dict_leng)
    kp = prepare_params(raw, n_tf, n_nf, dict_leng)

    out = jax.block_until_ready(mlpemb_pallas(x, kp, n_tf, dict_leng))
    ref = jax.block_until_ready(mlpemb_ref(x, raw, n_tf))

    np.testing.assert_allclose(np.asarray(out), np.asarray(ref), rtol=1e-4, atol=1e-4)
    print("KERNEL_OK")
</pallas_src>

<mosaic_0001>
module attributes {stable_mosaic.version = 11 : i64} {
  func.func @kernel(%arg0: i32, %arg1: memref<8x128xf32, #tpu.memory_space<vmem>>, %arg2: memref<128x128xf32, #tpu.memory_space<vmem>>, %arg3: memref<1x128xf32, #tpu.memory_space<vmem>>, %arg4: memref<128x128xf32, #tpu.memory_space<vmem>>, %arg5: memref<128x128xf32, #tpu.memory_space<vmem>>, %arg6: memref<1x128xf32, #tpu.memory_space<vmem>>, %arg7: memref<128x128xf32, #tpu.memory_space<vmem>>, %arg8: memref<1x128xf32, #tpu.memory_space<vmem>>, %arg9: memref<8x128xf32, #tpu.memory_space<vmem>>) attributes {dimension_semantics = [#tpu.dimension_semantics<parallel>], iteration_bounds = array<i64: 1>, scalar_prefetch = 0 : i64, scratch_operands = 0 : i64, tpu.core_type = #tpu.core_type<tc>, window_params = [{transform_indices = @transform_0, window_bounds = array<i64: 8, 128>}, {pipeline_mode = #tpu.pipeline_mode<synchronous>, transform_indices = @transform_1, window_bounds = array<i64: 128, 128>}, {pipeline_mode = #tpu.pipeline_mode<synchronous>, transform_indices = @transform_2, window_bounds = array<i64: 1, 128>}, {pipeline_mode = #tpu.pipeline_mode<synchronous>, transform_indices = @transform_3, window_bounds = array<i64: 128, 128>}, {pipeline_mode = #tpu.pipeline_mode<synchronous>, transform_indices = @transform_4, window_bounds = array<i64: 128, 128>}, {pipeline_mode = #tpu.pipeline_mode<synchronous>, transform_indices = @transform_5, window_bounds = array<i64: 1, 128>}, {pipeline_mode = #tpu.pipeline_mode<synchronous>, transform_indices = @transform_6, window_bounds = array<i64: 128, 128>}, {pipeline_mode = #tpu.pipeline_mode<synchronous>, transform_indices = @transform_7, window_bounds = array<i64: 1, 128>}, {transform_indices = @transform_8, window_bounds = array<i64: 8, 128>}]} {
    %c0 = arith.constant 0 : index
    %c0_0 = arith.constant 0 : index
    %0 = vector.load %arg1[%c0, %c0_0] : memref<8x128xf32, #tpu.memory_space<vmem>>, vector<8x128xf32>
    %1 = tpu.iota {dimensions = array<i32: 1>} : vector<8x128xi32>
    %cst = arith.constant 0.000000e+00 : f32
    %2 = vector.broadcast %cst : f32 to vector<8x128xf32>
    %3 = vector.extract_strided_slice %0 {offsets = [0, 0], sizes = [8, 1], strides = [1, 1]} : vector<8x128xf32> to vector<8x1xf32>
    %4 = math.roundeven %3 : vector<8x1xf32>
    %5 = arith.fptosi %4 : vector<8x1xf32> to vector<8x1xi32>
    %c0_i32 = arith.constant 0 : i32
    %6 = vector.broadcast %c0_i32 : i32 to vector<8x1xi32>
    %7 = arith.addi %5, %6 : vector<8x1xi32>
    %8 = vector.broadcast %7 : vector<8x1xi32> to vector<8x128xi32>
    %9 = arith.cmpi eq, %1, %8 : vector<8x128xi32>
    %10 = arith.extui %9 : vector<8x128xi1> to vector<8x128xi32>
    %11 = arith.sitofp %10 : vector<8x128xi32> to vector<8x128xf32>
    %12 = arith.addf %2, %11 : vector<8x128xf32>
    %13 = vector.extract_strided_slice %0 {offsets = [0, 1], sizes = [8, 1], strides = [1, 1]} : vector<8x128xf32> to vector<8x1xf32>
    %14 = math.roundeven %13 : vector<8x1xf32>
    %15 = arith.fptosi %14 : vector<8x1xf32> to vector<8x1xi32>
    %c10_i32 = arith.constant 10 : i32
    %16 = vector.broadcast %c10_i32 : i32 to vector<8x1xi32>
    %17 = arith.addi %15, %16 : vector<8x1xi32>
    %18 = vector.broadcast %17 : vector<8x1xi32> to vector<8x128xi32>
    %19 = arith.cmpi eq, %1, %18 : vector<8x128xi32>
    %20 = arith.extui %19 : vector<8x128xi1> to vector<8x128xi32>
    %21 = arith.sitofp %20 : vector<8x128xi32> to vector<8x128xf32>
    %22 = arith.addf %12, %21 : vector<8x128xf32>
    %c0_1 = arith.constant 0 : index
    %c0_2 = arith.constant 0 : index
    %23 = vector.load %arg2[%c0_1, %c0_2] : memref<128x128xf32, #tpu.memory_space<vmem>>, vector<128x128xf32>
    %cst_3 = arith.constant dense<0.000000e+00> : vector<8x128xf32>
    %24 = tpu.matmul %22, %23, %cst_3 {dimension_numbers = #tpu.dot_dimension_numbers<[1], [0], [0], [1], [0, 0, 1, 1], [], []>} : vector<8x128xf32>, vector<128x128xf32>, vector<8x128xf32> -> vector<8x128xf32>
    %c0_4 = arith.constant 0 : index
    %c0_5 = arith.constant 0 : index
    %25 = vector.load %arg3[%c0_4, %c0_5] : memref<1x128xf32, #tpu.memory_space<vmem>>, vector<1x128xf32>
    %26 = vector.broadcast %25 : vector<1x128xf32> to vector<8x128xf32>
    %27 = arith.addf %24, %26 : vector<8x128xf32>
    %c0_6 = arith.constant 0 : index
    %c0_7 = arith.constant 0 : index
    %28 = vector.load %arg5[%c0_6, %c0_7] : memref<128x128xf32, #tpu.memory_space<vmem>>, vector<128x128xf32>
    %cst_8 = arith.constant dense<0.000000e+00> : vector<8x128xf32>
    %29 = tpu.matmul %27, %28, %cst_8 {dimension_numbers = #tpu.dot_dimension_numbers<[1], [0], [0], [1], [0, 0, 1, 1], [], []>} : vector<8x128xf32>, vector<128x128xf32>, vector<8x128xf32> -> vector<8x128xf32>
    %c0_9 = arith.constant 0 : index
    %c0_10 = arith.constant 0 : index
    %30 = vector.load %arg4[%c0_9, %c0_10] : memref<128x128xf32, #tpu.memory_space<vmem>>, vector<128x128xf32>
    %cst_11 = arith.constant dense<0.000000e+00> : vector<8x128xf32>
    %31 = tpu.matmul %0, %30, %cst_11 {dimension_numbers = #tpu.dot_dimension_numbers<[1], [0], [0], [1], [0, 0, 1, 1], [], []>} : vector<8x128xf32>, vector<128x128xf32>, vector<8x128xf32> -> vector<8x128xf32>
    %32 = arith.addf %29, %31 : vector<8x128xf32>
    %c0_12 = arith.constant 0 : index
    %c0_13 = arith.constant 0 : index
    %33 = vector.load %arg6[%c0_12, %c0_13] : memref<1x128xf32, #tpu.memory_space<vmem>>, vector<1x128xf32>
    %34 = vector.broadcast %33 : vector<1x128xf32> to vector<8x128xf32>
    %35 = arith.addf %32, %34 : vector<8x128xf32>
    %c0_14 = arith.constant 0 : index
    %c0_15 = arith.constant 0 : index
    %36 = vector.load %arg7[%c0_14, %c0_15] : memref<128x128xf32, #tpu.memory_space<vmem>>, vector<128x128xf32>
    %cst_16 = arith.constant dense<0.000000e+00> : vector<8x128xf32>
    %37 = tpu.matmul %35, %36, %cst_16 {dimension_numbers = #tpu.dot_dimension_numbers<[1], [0], [0], [1], [0, 0, 1, 1], [], []>} : vector<8x128xf32>, vector<128x128xf32>, vector<8x128xf32> -> vector<8x128xf32>
    %c0_17 = arith.constant 0 : index
    %c0_18 = arith.constant 0 : index
    %38 = vector.load %arg8[%c0_17, %c0_18] : memref<1x128xf32, #tpu.memory_space<vmem>>, vector<1x128xf32>
    %39 = vector.broadcast %38 : vector<1x128xf32> to vector<8x128xf32>
    %40 = arith.addf %37, %39 : vector<8x128xf32>
    %c0_19 = arith.constant 0 : index
    %c0_20 = arith.constant 0 : index
    %41 = vector.load %arg9[%c0_19, %c0_20] : memref<8x128xf32, #tpu.memory_space<vmem>>, vector<8x128xf32>
    tpu.vector_store %arg9[%c0_19, %c0_20], %40 {strides = array<i32>} : memref<8x128xf32, #tpu.memory_space<vmem>>, vector<8x128xf32>,
    return
  }
  func.func @transform_0(%arg0: i32) -> (i32, i32) {
    %c0_i32 = arith.constant 0 : i32
    %c0_i32_0 = arith.constant 0 : i32
    return %arg0, %c0_i32 : i32, i32
  }
  func.func @transform_1(%arg0: i32) -> (i32, i32) {
    %c0_i32 = arith.constant 0 : i32
    %c0_i32_0 = arith.constant 0 : i32
    %c0_i32_1 = arith.constant 0 : i32
    return %c0_i32, %c0_i32_0 : i32, i32
  }
  func.func @transform_2(%arg0: i32) -> (i32, i32) {
    %c0_i32 = arith.constant 0 : i32
    %c0_i32_0 = arith.constant 0 : i32
    %c0_i32_1 = arith.constant 0 : i32
    return %c0_i32, %c0_i32_0 : i32, i32
  }
  func.func @transform_3(%arg0: i32) -> (i32, i32) {
    %c0_i32 = arith.constant 0 : i32
    %c0_i32_0 = arith.constant 0 : i32
    %c0_i32_1 = arith.constant 0 : i32
    return %c0_i32, %c0_i32_0 : i32, i32
  }
  func.func @transform_4(%arg0: i32) -> (i32, i32) {
    %c0_i32 = arith.constant 0 : i32
    %c0_i32_0 = arith.constant 0 : i32
    %c0_i32_1 = arith.constant 0 : i32
    return %c0_i32, %c0_i32_0 : i32, i32
  }
  func.func @transform_5(%arg0: i32) -> (i32, i32) {
    %c0_i32 = arith.constant 0 : i32
    %c0_i32_0 = arith.constant 0 : i32
    %c0_i32_1 = arith.constant 0 : i32
    return %c0_i32, %c0_i32_0 : i32, i32
  }
  func.func @transform_6(%arg0: i32) -> (i32, i32) {
    %c0_i32 = arith.constant 0 : i32
    %c0_i32_0 = arith.constant 0 : i32
    %c0_i32_1 = arith.constant 0 : i32
    return %c0_i32, %c0_i32_0 : i32, i32
  }
  func.func @transform_7(%arg0: i32) -> (i32, i32) {
    %c0_i32 = arith.constant 0 : i32
    %c0_i32_0 = arith.constant 0 : i32
    %c0_i32_1 = arith.constant 0 : i32
    return %c0_i32, %c0_i32_0 : i32, i32
  }
  func.func @transform_8(%arg0: i32) -> (i32, i32) {
    %c0_i32 = arith.constant 0 : i32
    %c0_i32_0 = arith.constant 0 : i32
    return %arg0, %c0_i32 : i32, i32
  }
}

</mosaic_0001>

<bundles_post_ra>
// kernel: tpu_custom_call.1
= control target key start
LH: loop header
LB: loop body
LE: loop exit
PB: predicated region body
PF: predicated region fallthrough
CT: control target
= control target key end

     0   :  { %13 = vsyncpa [#allocation3], 0  ;;  %s1163_s0 = inlined_call_operand.hbm [shape: f32[8,128], index: 0, kind: input, shape index: {}]   ;;  %s1164_s1 = inlined_call_operand.hbm [shape: f32[128,128], index: 1, kind: input, shape index: {}]   ;;  %s1165_s2 = inlined_call_operand.vmem [shape: f32[1,128], index: 2, kind: input, shape index: {}]   ;;  %s1166_s3 = inlined_call_operand.hbm [shape: f32[128,128], index: 3, kind: input, shape index: {}]   ;;  %s1167_s4 = inlined_call_operand.hbm [shape: f32[128,128], index: 4, kind: input, shape index: {}]   ;;  %s1168_s5 = inlined_call_operand.vmem [shape: f32[1,128], index: 5, kind: input, shape index: {}]   ;;  %s1169_s6 = inlined_call_operand.hbm [shape: f32[128,128], index: 6, kind: input, shape index: {}]   ;;  %s1170_s7 = inlined_call_operand.vmem [shape: f32[1,128], index: 7, kind: input, shape index: {}]   ;;  %s1171_s8 = inlined_call_operand.hbm [shape: f32[8,128], index: 8, kind: output, shape index: {}]  }
   0x1   :  { %14 = vsyncpa [#allocation6], 0 }
   0x2   :  { %15 = vsyncpa [#allocation9], 0 }
   0x3   :  { %16 = vsyncpa [#allocation4], 0  ;;  %s966_s27 = smov [#allocation5]   ;;  %s826_s9 = scalar_lea.hbm %s1164_s1, 2048 }
   0x4   :  { %s32_s28 = sshll.u32 %s966_s27, 4  ;;  %p827_p0 = scmp.ne.s32.totalorder %s1164_s1, %s826_s9  ;;  %s33_s28 = int_to_ptr.vmem [resolvable:$true] %s32_s28 }
   0x5   :  { %p830_p1 = scmp.lt.u32.totalorder %s826_s9, %s1164_s1 }
   0x7   :  { %p832_p2 = pnand %p830_p1, %p827_p0 }
   0x9   :  { %835 = shalt.err (!%p832_p2)
}
   0xa   :  { %s836_s14 = scalar_lea.vmem %s33_s28, 2048  ;;  %p841_p4 = scmp.lt.s32.totalorder %s33_s28, %s33_s28 }
   0xb   :  { %p837_p3 = scmp.ne.s32.totalorder %s33_s28, %s836_s14  ;;  %p842_p5 = scmp.lt.s32.totalorder %s836_s14, %s836_s14 }
   0xd   :  { %p843_p6 = por %p842_p5, %p841_p4 }
   0xf   :  { %p844_p7 = pnand %p843_p6, %p837_p3 }
  0x11   :  { %847 = shalt.err (!%p844_p7)
}
  0x12   :  { %s967_s15 = smov 128   ;;  %s968_s16 = smov 8  }
  0x13   :  { %38 = dma.hbm_to_vmem [thread:$0]  %s1164_s1, 2048, %s33_s28, [#allocation6], %s967_s15, %s967_s15, %s968_s16  }
  0x14   :  { %s969_s19 = smov [#allocation8]   ;;  %s970_s21 = smov [#allocation2]  }
  0x15   :  { %s58_s20 = sshll.u32 %s969_s19, 4  ;;  %s23_s22 = sshll.u32 %s970_s21, 4  ;;  %s59_s20 = int_to_ptr.vmem [resolvable:$true] %s58_s20  ;;  %s24_s22 = int_to_ptr.vmem [resolvable:$true] %s23_s22 }
  0x16   :  { %s848_s25 = scalar_lea.hbm %s1167_s4, 2048 }
  0x17   :  { %p849_p8 = scmp.ne.s32.totalorder %s1167_s4, %s848_s25  ;;  %p852_p9 = scmp.lt.u32.totalorder %s848_s25, %s1167_s4 }
  0x19   :  { %p854_p10 = pnand %p852_p9, %p849_p8 }
  0x1b   :  { %857 = shalt.err (!%p854_p10)
}
  0x1c   :  { %s858_s1 = scalar_lea.vmem %s59_s20, 2048  ;;  %p863_p12 = scmp.lt.s32.totalorder %s59_s20, %s59_s20 }
  0x1d   :  { %p859_p11 = scmp.ne.s32.totalorder %s59_s20, %s858_s1  ;;  %p864_p13 = scmp.lt.s32.totalorder %s858_s1, %s858_s1 }
  0x1f   :  { %p865_p0 = por %p864_p13, %p863_p12 }
  0x21   :  { %p866_p1 = pnand %p865_p0, %p859_p11 }
  0x23   :  { %869 = shalt.err (!%p866_p1)
}
  0x24   :  { %64 = dma.hbm_to_vmem [thread:$0]  %s1167_s4, 2048, %s59_s20, [#allocation9], %s967_s15, %s967_s15, %s968_s16  }
  0x25   :  { %s870_s12 = scalar_lea.hbm %s1163_s0, 128 }
  0x26   :  { %p871_p2 = scmp.ne.s32.totalorder %s1163_s0, %s870_s12  ;;  %p874_p3 = scmp.lt.u32.totalorder %s870_s12, %s1163_s0 }
  0x28   :  { %p876_p4 = pnand %p874_p3, %p871_p2 }
  0x2a   :  { %879 = shalt.err (!%p876_p4)
}
  0x2b   :  { %s880_s19 = scalar_lea.vmem %s24_s22, 128  ;;  %p885_p6 = scmp.lt.s32.totalorder %s24_s22, %s24_s22 }
  0x2c   :  { %p881_p5 = scmp.ne.s32.totalorder %s24_s22, %s880_s19  ;;  %p886_p7 = scmp.lt.s32.totalorder %s880_s19, %s880_s19 }
  0x2e   :  { %p887_p8 = por %p886_p7, %p885_p6 }
  0x30   :  { %p888_p9 = pnand %p887_p8, %p881_p5 }
  0x32   :  { %891 = shalt.err (!%p888_p9)
}
  0x33   :  { %26 = dma.hbm_to_vmem [thread:$0]  %s1163_s0, 128, %s24_s22, [#allocation3]  }
  0x34   :  { %s971_s21 = smov [#allocation7]   ;;  %s972_s24 = smov [#allocation10]  }
  0x35   :  { %s46_s23 = sshll.u32 %s971_s21, 4  ;;  %s72_s25 = sshll.u32 %s972_s24, 4  ;;  %s47_s23 = int_to_ptr.vmem [resolvable:$true] %s46_s23  ;;  %s73_s25 = int_to_ptr.vmem [resolvable:$true] %s72_s25 }
  0x36   :  { %s892_s29 = scalar_lea.hbm %s1166_s3, 2048 }
  0x37   :  { %p893_p10 = scmp.ne.s32.totalorder %s1166_s3, %s892_s29  ;;  %p896_p11 = scmp.lt.u32.totalorder %s892_s29, %s1166_s3 }
  0x39   :  { %p898_p12 = pnand %p896_p11, %p893_p10 }
  0x3b   :  { %901 = shalt.err (!%p898_p12)
}
  0x3c   :  { %s902_s0 = scalar_lea.vmem %s47_s23, 2048  ;;  %p907_p0 = scmp.lt.s32.totalorder %s47_s23, %s47_s23 }
  0x3d   :  { %p903_p13 = scmp.ne.s32.totalorder %s47_s23, %s902_s0  ;;  %p908_p1 = scmp.lt.s32.totalorder %s902_s0, %s902_s0 }
  0x3f   :  { %p909_p2 = por %p908_p1, %p907_p0 }
  0x41   :  { %p910_p3 = pnand %p909_p2, %p903_p13 }
  0x43   :  { %913 = shalt.err (!%p910_p3)
}
  0x44   :  { %52 = dma.hbm_to_vmem [thread:$0]  %s1166_s3, 2048, %s47_s23, [#allocation6], %s967_s15, %s967_s15, %s968_s16  }
  0x45   :  { %s914_s13 = scalar_lea.hbm %s1169_s6, 2048 }
  0x46   :  { %p915_p4 = scmp.ne.s32.totalorder %s1169_s6, %s914_s13  ;;  %p918_p5 = scmp.lt.u32.totalorder %s914_s13, %s1169_s6 }
  0x48   :  { %p920_p6 = pnand %p918_p5, %p915_p4 }
  0x4a   :  { %923 = shalt.err (!%p920_p6)
}
  0x4b   :  { %s924_s4 = scalar_lea.vmem %s73_s25, 2048  ;;  %p929_p8 = scmp.lt.s32.totalorder %s73_s25, %s73_s25 }
  0x4c   :  { %p925_p7 = scmp.ne.s32.totalorder %s73_s25, %s924_s4  ;;  %p930_p9 = scmp.lt.s32.totalorder %s924_s4, %s924_s4 }
  0x4e   :  { %p931_p10 = por %p930_p9, %p929_p8 }
  0x50   :  { %p932_p11 = pnand %p931_p10, %p925_p7 }
  0x52   :  { %935 = shalt.err (!%p932_p11)
}
  0x53   :  { %78 = dma.hbm_to_vmem [thread:$0]  %s1169_s6, 2048, %s73_s25, [#allocation9], %s967_s15, %s967_s15, %s968_s16  }
  0x54   :  { %958 = dma.done.wait [#allocation3], 128  }
  0x55   :  { %959 = vsyncadd [#allocation3], 4294967168 }
  0x56   :  { %960 = dma.done.wait [#allocation6], 4096  }
  0x57   :  { %961 = vsyncadd [#allocation6], 4294963200 }
  0x58   :  { %962 = dma.done.wait [#allocation9], 4096  }
  0x59   :  { %963 = vsyncadd [#allocation9], 4294963200  ;;  %v973_v0 = vmov 0   ;;  %v974_v1 = vmov 0.0|0.0   ;;  %v1098_v2 = vld [vmem:[#allocation2] sm:$0xff]  ;;  %v115_v3 = vld [vmem:[#allocation5] sm:$0xff]  ;;  %v97_v55 = vlaneseq }
  0x5a   :  { %824 = vset.pattern.permute.xlu0 %v973_v0  ;;  %712 = vmatprep.subr.bf16.mxu0 %v974_v1  ;;  %v116_v4 = vld [vmem:[#allocation5 + $0x8] sm:$0xff]  ;;  %v810_v5 = vcvt.f32.s32 %v1098_v2  ;;  %v117_v7 = vld [vmem:[#allocation5 + $0x10] sm:$0xff]  ;;  %v118_v8 = vld [vmem:[#allocation5 + $0x18] sm:$0xff]  ;;  %v975_v13 = vmov 1   ;;  %vm976_vm0 = vmmov 0   ;;  %v977_v19 = vmov 0.0  }
  0x5b   :  { %736 = vmatprep.subr.bf16.mxu1 %v974_v1  ;;  %v713_v6 = vpack.c.bf16 %v116_v4, %v115_v3  ;;  %v716_v9 = vpack.c.bf16 %v118_v8, %v117_v7  ;;  %v119_v11 = vld [vmem:[#allocation5 + $0x20] sm:$0xff]  ;;  %v120_v12 = vld [vmem:[#allocation5 + $0x28] sm:$0xff]  ;;  %v121_v15 = vld [vmem:[#allocation5 + $0x30] sm:$0xff]  ;;  %604 = vmatprep.mubr.msk.f32.mxu0 %vm976_vm0, %v977_v19  ;;  %v98_v56 = vand.u32 127, %v97_v55 }
  0x5c   :  { %101 = vperm.xlu0 %824, %v810_v5   ;;  %v107_v10 = vadd.s32 10, %v810_v5  ;;  %v719_v14 = vpack.c.bf16 %v120_v12, %v119_v11  ;;  %v122_v16 = vld [vmem:[#allocation5 + $0x38] sm:$0xff]  ;;  %v123_v18 = vld [vmem:[#allocation5 + $0x40] sm:$0xff]  ;;  %v124_v20 = vld [vmem:[#allocation5 + $0x48] sm:$0xff]  ;;  %639 = vmatprep.mubr.msk.f32.mxu1 %vm976_vm0, %v977_v19 }
  0x5d   :  { %714 = vmatpush3.bf16.msra.mxu0 %v713_v6  ;;  %v722_v17 = vpack.c.bf16 %v122_v16, %v121_v15  ;;  %v224_v21 = vld [vmem:[#allocation7] sm:$0xff]  ;;  %v225_v22 = vld [vmem:[#allocation7 + $0x8] sm:$0xff]  ;;  %v226_v24 = vld [vmem:[#allocation7 + $0x10] sm:$0xff]  ;;  %v725_v26 = vpack.c.bf16 %v124_v20, %v123_v18 }
  0x5e   :  { %715 = vmatprep.subr.bf16.mxu0 %v974_v1  ;;  %v737_v23 = vpack.c.bf16 %v225_v22, %v224_v21  ;;  %v227_v25 = vld [vmem:[#allocation7 + $0x18] sm:$0xff]  ;;  %v125_v28 = vld [vmem:[#allocation5 + $0x50] sm:$0xff]  ;;  %v228_v30 = vld [vmem:[#allocation7 + $0x20] sm:$0xff] }
  0x5f   :  { %v740_v27 = vpack.c.bf16 %v227_v25, %v226_v24  ;;  %v126_v29 = vld [vmem:[#allocation5 + $0x58] sm:$0xff]  ;;  %v229_v31 = vld [vmem:[#allocation7 + $0x28] sm:$0xff]  ;;  %v127_v34 = vld [vmem:[#allocation5 + $0x60] sm:$0xff] }
  0x60   :  { %825 = vset.pattern.permute.xlu0 %v975_v13  ;;  %738 = vmatpush3.bf16.msra.mxu1 %v737_v23  ;;  %v728_v32 = vpack.c.bf16 %v126_v29, %v125_v28  ;;  %v743_v33 = vpack.c.bf16 %v229_v31, %v228_v30  ;;  %v128_v35 = vld [vmem:[#allocation5 + $0x68] sm:$0xff]  ;;  %v230_v36 = vld [vmem:[#allocation7 + $0x30] sm:$0xff]  ;;  %v231_v37 = vld [vmem:[#allocation7 + $0x38] sm:$0xff] }
  0x61   :  { %717 = vmatpush3.bf16.msra.mxu0 %v716_v9  ;;  %109 = vperm.xlu0 %825, %v107_v10   ;;  %v731_v38 = vpack.c.bf16 %v128_v35, %v127_v34  ;;  %v746_v39 = vpack.c.bf16 %v231_v37, %v230_v36  ;;  %v129_v40 = vld [vmem:[#allocation5 + $0x70] sm:$0xff]  ;;  %v130_v41 = vld [vmem:[#allocation5 + $0x78] sm:$0xff]  ;;  %v232_v42 = vld [vmem:[#allocation7 + $0x40] sm:$0xff] }
  0x62   :  { %718 = vmatprep.subr.bf16.mxu0 %v974_v1  ;;  %739 = vmatprep.subr.bf16.mxu1 %v974_v1  ;;  %v233_v43 = vld [vmem:[#allocation7 + $0x48] sm:$0xff]  ;;  %v734_v44 = vpack.c.bf16 %v130_v41, %v129_v40  ;;  %v234_v46 = vld [vmem:[#allocation7 + $0x50] sm:$0xff]  ;;  %v235_v47 = vld [vmem:[#allocation7 + $0x58] sm:$0xff] }
  0x63   :  { %v749_v45 = vpack.c.bf16 %v233_v43, %v232_v42  ;;  %v752_v48 = vpack.c.bf16 %v235_v47, %v234_v46  ;;  %v236_v49 = vld [vmem:[#allocation7 + $0x60] sm:$0xff]  ;;  %v237_v50 = vld [vmem:[#allocation7 + $0x68] sm:$0xff]  ;;  %v238_v52 = vld [vmem:[#allocation7 + $0x70] sm:$0xff] }
  0x64   :  { %741 = vmatpush3.bf16.msra.mxu1 %v740_v27  ;;  %v755_v51 = vpack.c.bf16 %v237_v50, %v236_v49  ;;  %v239_v53 = vld [vmem:[#allocation7 + $0x78] sm:$0xff]  ;;  %v208_v58 = vld [vmem:[#allocation8] sm:$0xff]  ;;  %v209_v59 = vld [vmem:[#allocation8 + $0x8] sm:$0xff] }
  0x65   :  { %720 = vmatpush3.bf16.msra.mxu0 %v719_v14  ;;  %742 = vmatprep.subr.bf16.mxu1 %v974_v1  ;;  %v758_v54 = vpack.c.bf16 %v239_v53, %v238_v52  ;;  %v761_v63 = vpack.c.bf16 %v209_v59, %v208_v58  ;;  %v210_v3 = vld [vmem:[#allocation8 + $0x10] sm:$0xff]  ;;  %v211_v4 = vld [vmem:[#allocation8 + $0x18] sm:$0xff]  ;;  %v212_v5 = vld [vmem:[#allocation8 + $0x20] sm:$0xff] }
  0x66   :  { %721 = vmatprep.subr.bf16.mxu0 %v974_v1  ;;  %v213_v6 = vld [vmem:[#allocation8 + $0x28] sm:$0xff]  ;;  %v214_v8 = vld [vmem:[#allocation8 + $0x30] sm:$0xff]  ;;  %v215_v9 = vld [vmem:[#allocation8 + $0x38] sm:$0xff] }
  0x67   :  { %v767_v7 = vpack.c.bf16 %v213_v6, %v212_v5  ;;  %v770_v10 = vpack.c.bf16 %v215_v9, %v214_v8  ;;  %v216_v11 = vld [vmem:[#allocation8 + $0x40] sm:$0xff]  ;;  %v217_v12 = vld [vmem:[#allocation8 + $0x48] sm:$0xff]  ;;  %v218_v14 = vld [vmem:[#allocation8 + $0x50] sm:$0xff] }
  0x68   :  { %744 = vmatpush3.bf16.msra.mxu1 %v743_v33  ;;  %v773_v13 = vpack.c.bf16 %v217_v12, %v216_v11  ;;  %v219_v15 = vld [vmem:[#allocation8 + $0x58] sm:$0xff]  ;;  %v221_v18 = vld [vmem:[#allocation8 + $0x68] sm:$0xff]  ;;  %v222_v20 = vld [vmem:[#allocation8 + $0x70] sm:$0xff] }
  0x69   :  { %723 = vmatpush3.bf16.msra.mxu0 %v722_v17  ;;  %745 = vmatprep.subr.bf16.mxu1 %v974_v1  ;;  %v776_v16 = vpack.c.bf16 %v219_v15, %v218_v14  ;;  %v220_v17 = vld [vmem:[#allocation8 + $0x60] sm:$0xff]  ;;  %v223_v21 = vld [vmem:[#allocation8 + $0x78] sm:$0xff]  ;;  %v389_v24 = vld [vmem:[#allocation10 + $0x8] sm:$0xff] }
  0x6a   :  { %724 = vmatprep.subr.bf16.mxu0 %v974_v1  ;;  %v782_v22 = vpack.c.bf16 %v223_v21, %v222_v20  ;;  %v388_v23 = vld [vmem:[#allocation10] sm:$0xff]  ;;  %v390_v25 = vld [vmem:[#allocation10 + $0x10] sm:$0xff]  ;;  %v391_v27 = vld [vmem:[#allocation10 + $0x18] sm:$0xff] }
  0x6b   :  { %v788_v28 = vpack.c.bf16 %v391_v27, %v390_v25  ;;  %v392_v29 = vld [vmem:[#allocation10 + $0x20] sm:$0xff]  ;;  %v393_v30 = vld [vmem:[#allocation10 + $0x28] sm:$0xff]  ;;  %v395_v33 = vld [vmem:[#allocation10 + $0x38] sm:$0xff] }
  0x6c   :  { %747 = vmatpush3.bf16.msra.mxu1 %v746_v39  ;;  %v791_v31 = vpack.c.bf16 %v393_v30, %v392_v29  ;;  %v396_v35 = vld [vmem:[#allocation10 + $0x40] sm:$0xff]  ;;  %v397_v36 = vld [vmem:[#allocation10 + $0x48] sm:$0xff]  ;;  %v399_v39 = vld [vmem:[#allocation10 + $0x58] sm:$0xff] }
  0x6d   :  { %726 = vmatpush3.bf16.msra.mxu0 %v725_v26  ;;  %748 = vmatprep.subr.bf16.mxu1 %v974_v1  ;;  %v785_v26 = vpack.c.bf16 %v389_v24, %v388_v23  ;;  %v797_v37 = vpack.c.bf16 %v397_v36, %v396_v35  ;;  %v400_v41 = vld [vmem:[#allocation10 + $0x60] sm:$0xff]  ;;  %v401_v42 = vld [vmem:[#allocation10 + $0x68] sm:$0xff]  ;;  %v501_v46 = vld [vmem:[%s1165_s2] ss:$0 sm:$0xff]  ;;  %s978_s2 = smov [#allocation11]  }
  0x6e   :  { %727 = vmatprep.subr.bf16.mxu0 %v974_v1  ;;  %v803_v43 = vpack.c.bf16 %v401_v42, %v400_v41  ;;  %v402_v50 = vld [vmem:[#allocation10 + $0x70] sm:$0xff]  ;;  %s488_s25 = sshll.u32 %s978_s2, 4  ;;  %s489_s25 = int_to_ptr.vmem [resolvable:$true] %s488_s25 }
  0x6f   :  { %s936_s26 = scalar_lea.vmem %s489_s25, 128  ;;  %p941_p13 = scmp.lt.s32.totalorder %s489_s25, %s489_s25 }
  0x70   :  { %750 = vmatpush3.bf16.msra.mxu1 %v749_v45  ;;  %p937_p12 = scmp.ne.s32.totalorder %s489_s25, %s936_s26  ;;  %p942_p0 = scmp.lt.s32.totalorder %s936_s26, %s936_s26 }
  0x71   :  { %729 = vmatpush3.bf16.msra.mxu0 %v728_v32  ;;  %751 = vmatprep.subr.bf16.mxu1 %v974_v1  ;;  %v394_v32 = vld [vmem:[#allocation10 + $0x30] sm:$0xff] }
  0x72   :  { %730 = vmatprep.subr.bf16.mxu0 %v974_v1  ;;  %v794_v34 = vpack.c.bf16 %v395_v33, %v394_v32  ;;  %p943_p1 = por %p942_p0, %p941_p13 }
  0x74   :  { %753 = vmatpush3.bf16.msra.mxu1 %v752_v48  ;;  %p944_p2 = pnand %p943_p1, %p937_p12 }
  0x75   :  { %732 = vmatpush3.bf16.msra.mxu0 %v731_v38  ;;  %754 = vmatprep.subr.bf16.mxu1 %v974_v1  ;;  %v398_v38 = vld [vmem:[#allocation10 + $0x50] sm:$0xff] }
  0x76   :  { %733 = vmatprep.subr.bf16.mxu0 %v974_v1  ;;  %v800_v40 = vpack.c.bf16 %v399_v39, %v398_v38 }
  0x78   :  { %756 = vmatpush3.bf16.msra.mxu1 %v755_v51  ;;  %v403_v51 = vld [vmem:[#allocation10 + $0x78] sm:$0xff] }
  0x79   :  { %735 = vmatpush3.bf16.msra.mxu0 %v734_v44  ;;  %757 = vmatprep.subr.bf16.mxu1 %v974_v1  ;;  %v806_v52 = vpack.c.bf16 %v403_v51, %v402_v50 }
  0x7a   :  { %760 = vmatprep.subr.bf16.mxu0 %v974_v1 }
  0x7c   :  { %759 = vmatpush3.bf16.msra.mxu1 %v758_v54  ;;  %v502_v54 = vld [vmem:[%s1168_s5] ss:$0 sm:$0xff] }
  0x7d   :  { %784 = vmatprep.subr.bf16.mxu1 %v974_v1 }
  0x7f   :  { %640 = vmatmul.mubr.f32.vlgmr.msra.gmra.mrb[0].mxu1 %v1098_v2  ;;  %v764_v2 = vpack.c.bf16 %v211_v4, %v210_v3 }
  0x80   :  { %709 = vmatprep.mubr.msk.f32.mxu1 %vm976_vm0, %v977_v19  ;;  %786 = vmatpush3.bf16.msra.mxu1 %v785_v26 }
  0x81   :  { %787 = vmatprep.subr.bf16.mxu1 %v974_v1 }
  0x84   :  { %789 = vmatpush3.bf16.msra.mxu1 %v788_v28 }
  0x85   :  { %790 = vmatprep.subr.bf16.mxu1 %v974_v1 }
  0x88   :  { %792 = vmatpush3.bf16.msra.mxu1 %v791_v31 }
  0x89   :  { %793 = vmatprep.subr.bf16.mxu1 %v974_v1 }
  0x8c   :  { %795 = vmatpush3.bf16.msra.mxu1 %v794_v34 }
  0x8d   :  { %796 = vmatprep.subr.bf16.mxu1 %v974_v1 }
  0x90   :  { %798 = vmatpush3.bf16.msra.mxu1 %v797_v37 }
  0x91   :  { %799 = vmatprep.subr.bf16.mxu1 %v974_v1 }
  0x94   :  { %801 = vmatpush3.bf16.msra.mxu1 %v800_v40 }
  0x95   :  { %802 = vmatprep.subr.bf16.mxu1 %v974_v1 }
  0x98   :  { %804 = vmatpush3.bf16.msra.mxu1 %v803_v43 }
  0x99   :  { %805 = vmatprep.subr.bf16.mxu1 %v974_v1 }
  0x9c   :  { %807 = vmatpush3.bf16.msra.mxu1 %v806_v52 }
  0xdb   :  { %v102_v57 = vpop.permute.xlu0 %101 }
  0xdc   :  { %vm103_vm1 = vcmp.eq.s32.totalorder %v98_v56, %v102_v57  ;;  %v503_v57 = vld [vmem:[%s1170_s7] ss:$0 sm:$0xff] }
  0xdd   :  { %v499_v61 = vsel %vm103_vm1, 1.0, %v977_v19 }
  0xe0   :  { %v110_v60 = vpop.permute.xlu0 %109 }
  0xe1   :  { %vm111_vm2 = vcmp.eq.s32.totalorder %v98_v56, %v110_v60 }
  0xe2   :  { %v500_v62 = vsel %vm111_vm2, 1.0, %v977_v19 }
  0xe3   :  { %v114_v0 = vadd.f32 %v500_v62, %v499_v61 }
  0xe5   :  { %605 = vmatmul.mubr.f32.vlgmr.msra.gmra.mrb[0].mxu0 %v114_v0 }
  0xe6   :  { %762 = vmatpush3.bf16.msra.mxu0 %v761_v63  ;;  %674 = vmatprep.mubr.msk.f32.mxu0 %vm976_vm0, %v977_v19  ;;  %v779_v19 = vpack.c.bf16 %v221_v18, %v220_v17 }
  0xe7   :  { %763 = vmatprep.subr.bf16.mxu0 %v974_v1 }
  0xea   :  { %765 = vmatpush3.bf16.msra.mxu0 %v764_v2 }
  0xeb   :  { %766 = vmatprep.subr.bf16.mxu0 %v974_v1 }
  0xee   :  { %768 = vmatpush3.bf16.msra.mxu0 %v767_v7 }
  0xef   :  { %769 = vmatprep.subr.bf16.mxu0 %v974_v1 }
  0xf2   :  { %771 = vmatpush3.bf16.msra.mxu0 %v770_v10 }
  0xf3   :  { %772 = vmatprep.subr.bf16.mxu0 %v974_v1 }
  0xf6   :  { %774 = vmatpush3.bf16.msra.mxu0 %v773_v13 }
  0xf7   :  { %775 = vmatprep.subr.bf16.mxu0 %v974_v1 }
  0xfa   :  { %777 = vmatpush3.bf16.msra.mxu0 %v776_v16 }
  0xfb   :  { %778 = vmatprep.subr.bf16.mxu0 %v974_v1 }
  0xfe   :  { %780 = vmatpush3.bf16.msra.mxu0 %v779_v19 }
  0xff   :  { %781 = vmatprep.subr.bf16.mxu0 %v974_v1 }
 0x102   :  { %783 = vmatpush3.bf16.msra.mxu0 %v782_v22 }
 0x152   :  { %v306_v44 = vpop.f32.mrb[0].mxu1 }
 0x153   :  { %v641_v45 = vpop.f32.mrb[1].mxu1 }
 0x1b8   :  { %v204_v47 = vpop.f32.mrb[0].mxu0 }
 0x1b9   :  { %v205_v48 = vadd.f32 %v501_v46, %v204_v47  ;;  %v606_v49 = vpop.f32.mrb[1].mxu0 }
 0x1bb   :  { %675 = vmatmul.mubr.f32.vlgmr.msra.gmra.mrb[2].mxu0 %v205_v48 }
 0x28e   :  { %v376_v53 = vpop.f32.mrb[2].mxu0 }
 0x28f   :  { %v377_v1 = vadd.f32 %v376_v53, %v306_v44  ;;  %v676_v55 = vpop.f32.mrb[3].mxu0 }
 0x291   :  { %v387_v56 = vadd.f32 %v502_v54, %v377_v1 }
 0x293   :  { %710 = vmatmul.mubr.f32.vlgmr.msra.gmra.mrb[2].mxu1 %v387_v56 }
 0x366   :  { %v477_v58 = vpop.f32.mrb[2].mxu1 }
 0x367   :  { %v478_v59 = vadd.f32 %v503_v57, %v477_v58  ;;  %v711_v60 = vpop.f32.mrb[3].mxu1 }
 0x369   :  { %481 = vst [vmem:[#allocation11] sm:$0xff] %v478_v59 }
 0x36a   :  { %947 = shalt.err (!%p944_p2)
}
 0x36b   :  { %s948_s29 = scalar_lea.hbm %s1171_s8, 128 }
 0x36c   :  { %p949_p3 = scmp.ne.s32.totalorder %s1171_s8, %s948_s29  ;;  %p952_p4 = scmp.lt.u32.totalorder %s948_s29, %s1171_s8 }
 0x36e   :  { %p954_p5 = pnand %p952_p4, %p949_p3 }
 0x370   :  { %957 = shalt.err (!%p954_p5)
}
 0x371   :  { %491 = dma.vmem_to_hbm [thread:$0]  %s489_s25, 128, %s1171_s8, [#allocation4]  }
 0x372   :  { %964 = dma.done.wait [#allocation4], 128  }
 0x373   :  { %965 = vsyncadd [#allocation4], 4294967168 }
 0x374   :  { %495 = vsyncpa [#allocation3], 1 }
 0x375   :  { %496 = vsyncpa [#allocation6], 1 }
 0x376   :  { %497 = vsyncpa [#allocation9], 1 }
 0x377   :  { %498 = vsyncpa [#allocation4], 1 }

</bundles_post_ra>
